<compile_context>
chip_gen: v7x
topology: tpu7x:2x2x1
jax: 0.10.0
libtpu: 0.0.40
codegen_flags: <defaults>
</compile_context>

<pallas_src>
import jax
import jax.numpy as jnp
from jax.experimental import pallas as pl
from jax.experimental.pallas import tpu as pltpu

N_IN = 784            # 1 * 28 * 28 (contraction dim, kept unpadded)
N_OUT = 20
N_OUT_PAD = 128       # lane-dense output width (full-width unmasked vst)
MAX_TILE_B = 1024     # ~8 MB double-buffered -> fits v5e's 16 MiB default scoped VMEM
NEG_BIG = -1e30       # Python float: avoids capturing a traced f32[] constant


def _round_up(n, m):
    return ((n + m - 1) // m) * m


def _choose_tile_b(B):
    """Balanced batch tiles; >=2 grid steps for large B (v7x megacore)."""
    if B <= 16:
        return _round_up(B, 8)
    num_tiles = max(2, pl.cdiv(B, MAX_TILE_B))
    tile = pl.cdiv(B, num_tiles)
    return min(MAX_TILE_B, _round_up(tile, 16))


def fcnet_kernel(x_ref, w_ref, b_ref, o_ref):
    # x_ref: (TILE_B, 784) f32   w_ref: (784, 128) bf16
    # b_ref: (1, 128) f32        o_ref: (TILE_B, 128) f32
    x = x_ref[...].astype(jnp.bfloat16)          # in-kernel cast feeding the MXU
    w = w_ref[...]

    # fc1: bf16 operands on the MXU, f32 accumulation, f32 bias add.
    h = jnp.dot(x, w, preferred_element_type=jnp.float32) + b_ref[...]

    # Fused relu + padded-lane mask: real lanes -> max(h, 0); padded lanes
    # (cols >= 20) -> large negative so they vanish from the log_softmax.
    # (The second relu in the reference is idempotent; dropout is identity at
    # inference, so a single relu is exact.)
    col = jax.lax.broadcasted_iota(jnp.int32, h.shape, 1)
    h = jnp.where(col < N_OUT, jnp.maximum(h, 0.0), NEG_BIG)

    # log_softmax over the feature axis (dim=1), all in f32 (v5e VPU/EUP have
    # no bf16 path; tile is VMEM-resident so no bandwidth cost).
    m = jnp.max(h, axis=1, keepdims=True)
    shifted = h - m
    lse = jnp.log(jnp.sum(jnp.exp(shifted), axis=1, keepdims=True))
    o_ref[...] = (shifted - lse).astype(o_ref.dtype)


def prepare_params(w1, b1):
    """One-time parameter prep: transpose, pad N->128, cast W to bf16."""
    w1_t = jnp.transpose(w1).astype(jnp.float32)                    # (784, 20)
    w_pad = jnp.zeros((N_IN, N_OUT_PAD), jnp.float32)
    w_pad = w_pad.at[:, :N_OUT].set(w1_t).astype(jnp.bfloat16)      # (784, 128) bf16
    b_pad = jnp.zeros((1, N_OUT_PAD), jnp.float32)
    b_pad = b_pad.at[0, :N_OUT].set(b1.astype(jnp.float32))         # (1, 128) f32
    return w_pad, b_pad


@jax.jit
def fcnet_forward(x_nchw, w_pad, b_pad):
    """x_nchw: (B, C, H, W) with C*H*W == 784. Returns (B, 20) log-probs (f32)."""
    B = x_nchw.shape[0]
    # Raw f32 activations go straight into the kernel: no padded copy, no
    # wrapper-side cast.
    x_flat = x_nchw.reshape(B, N_IN).astype(jnp.float32)            # (B, 784)

    tile_b = _choose_tile_b(B)
    grid = (pl.cdiv(B, tile_b),)

    out = pl.pallas_call(
        fcnet_kernel,
        out_shape=jax.ShapeDtypeStruct((B, N_OUT_PAD), jnp.float32),
        grid=grid,
        in_specs=[
            pl.BlockSpec((tile_b, N_IN), lambda i: (i, 0)),          # batch-tiled x
            pl.BlockSpec((N_IN, N_OUT_PAD), lambda i: (0, 0)),       # weights resident
            pl.BlockSpec((1, N_OUT_PAD), lambda i: (0, 0)),          # bias resident
        ],
        out_specs=pl.BlockSpec((tile_b, N_OUT_PAD), lambda i: (i, 0)),
        compiler_params=pltpu.CompilerParams(
            dimension_semantics=("parallel",),                       # megacore on v7x
        ),
    )(x_flat, w_pad, b_pad)

    # Rows are already exactly B (partial last block handled by Pallas, and
    # log_softmax is strictly row-wise); only the cheap 20-lane slice remains.
    return out[:, :N_OUT]


def init_params(key):
    # Mimic PyTorch nn.Linear default init: U(-1/sqrt(fan_in), 1/sqrt(fan_in)).
    k_w1, k_b1 = jax.random.split(key, 2)
    bound1 = 1.0 / jnp.sqrt(784.0)
    w1 = jax.random.uniform(k_w1, (20, 784), jnp.float32, -bound1, bound1)
    b1 = jax.random.uniform(k_b1, (20,), jnp.float32, -bound1, bound1)
    # fc2 exists in __init__ but is never used in forward; omitted.
    return w1, b1


if __name__ == "__main__":
    key = jax.random.PRNGKey(0)
    k_x, k_p = jax.random.split(key)

    # MNIST-like input (batch=2, 1 channel, 28x28 -> 784 features)
    x = jax.random.normal(k_x, (2, 1, 28, 28), jnp.float32)
    w1, b1 = init_params(k_p)

    # Parameters are prepared once (transpose/pad/cast hoisted off the call path).
    w_pad, b_pad = prepare_params(w1, b1)

    out = fcnet_forward(x, w_pad, b_pad)
    out = jax.block_until_ready(out)

    # Sanity check against a plain-JAX f32 reference of the same forward pass.
    h_ref = jnp.maximum(x.reshape(2, -1) @ w1.T + b1, 0.0)
    ref = jax.nn.log_softmax(h_ref, axis=1)
    assert out.shape == (2, 20)
    assert jnp.allclose(out, ref, atol=2e-2), "mismatch vs reference"  # bf16 matmul tolerance

    print("KERNEL_OK")
</pallas_src>

<mosaic_0001>
module attributes {stable_mosaic.version = 11 : i64} {
  func.func @fcnet_kernel(%arg0: i32, %arg1: memref<8x784xf32, #tpu.memory_space<vmem>>, %arg2: memref<784x128xbf16, #tpu.memory_space<vmem>>, %arg3: memref<1x128xf32, #tpu.memory_space<vmem>>, %arg4: memref<8x128xf32, #tpu.memory_space<vmem>>) attributes {dimension_semantics = [#tpu.dimension_semantics<parallel>], iteration_bounds = array<i64: 1>, scalar_prefetch = 0 : i64, scratch_operands = 0 : i64, tpu.core_type = #tpu.core_type<tc>, window_params = [{transform_indices = @transform_0, window_bounds = array<i64: 8, 784>}, {pipeline_mode = #tpu.pipeline_mode<synchronous>, transform_indices = @transform_1, window_bounds = array<i64: 784, 128>}, {pipeline_mode = #tpu.pipeline_mode<synchronous>, transform_indices = @transform_2, window_bounds = array<i64: 1, 128>}, {transform_indices = @transform_3, window_bounds = array<i64: 8, 128>}]} {
    %c0 = arith.constant 0 : index
    %c0_0 = arith.constant 0 : index
    %0 = vector.load %arg1[%c0, %c0_0] : memref<8x784xf32, #tpu.memory_space<vmem>>, vector<8x784xf32>
    %1 = arith.truncf %0 : vector<8x784xf32> to vector<8x784xbf16>
    %c0_1 = arith.constant 0 : index
    %c0_2 = arith.constant 0 : index
    %2 = vector.load %arg2[%c0_1, %c0_2] : memref<784x128xbf16, #tpu.memory_space<vmem>>, vector<784x128xbf16>
    %cst = arith.constant dense<0.000000e+00> : vector<8x128xf32>
    %3 = tpu.matmul %1, %2, %cst {dimension_numbers = #tpu.dot_dimension_numbers<[1], [0], [0], [1], [0, 0, 1, 1], [], []>} : vector<8x784xbf16>, vector<784x128xbf16>, vector<8x128xf32> -> vector<8x128xf32>
    %c0_3 = arith.constant 0 : index
    %c0_4 = arith.constant 0 : index
    %4 = vector.load %arg3[%c0_3, %c0_4] : memref<1x128xf32, #tpu.memory_space<vmem>>, vector<1x128xf32>
    %5 = vector.broadcast %4 : vector<1x128xf32> to vector<8x128xf32>
    %6 = arith.addf %3, %5 : vector<8x128xf32>
    %7 = tpu.iota {dimensions = array<i32: 1>} : vector<8x128xi32>
    %c20_i32 = arith.constant 20 : i32
    %8 = vector.broadcast %c20_i32 : i32 to vector<8x128xi32>
    %9 = arith.cmpi slt, %7, %8 : vector<8x128xi32>
    %cst_5 = arith.constant 0.000000e+00 : f32
    %10 = vector.broadcast %cst_5 : f32 to vector<8x128xf32>
    %11 = arith.maximumf %6, %10 : vector<8x128xf32>
    %cst_6 = arith.constant -1.000000e+30 : f32
    %12 = vector.broadcast %cst_6 : f32 to vector<8x128xf32>
    %13 = arith.select %9, %11, %12 : vector<8x128xi1>, vector<8x128xf32>
    %cst_7 = arith.constant dense<0xFF800000> : vector<8xf32>
    %14 = vector.multi_reduction <maximumf>, %13, %cst_7 [1] : vector<8x128xf32> to vector<8xf32>
    %15 = vector.shape_cast %14 : vector<8xf32> to vector<8x1xf32>
    %16 = vector.broadcast %15 : vector<8x1xf32> to vector<8x128xf32>
    %17 = arith.subf %13, %16 : vector<8x128xf32>
    %18 = math.exp %17 : vector<8x128xf32>
    %cst_8 = arith.constant dense<0.000000e+00> : vector<8xf32>
    %19 = vector.multi_reduction <add>, %18, %cst_8 [1] : vector<8x128xf32> to vector<8xf32>
    %20 = vector.shape_cast %19 : vector<8xf32> to vector<8x1xf32>
    %21 = math.log %20 : vector<8x1xf32>
    %22 = vector.broadcast %21 : vector<8x1xf32> to vector<8x128xf32>
    %23 = arith.subf %17, %22 : vector<8x128xf32>
    %c0_9 = arith.constant 0 : index
    %c0_10 = arith.constant 0 : index
    %24 = vector.load %arg4[%c0_9, %c0_10] : memref<8x128xf32, #tpu.memory_space<vmem>>, vector<8x128xf32>
    tpu.vector_store %arg4[%c0_9, %c0_10], %23 {strides = array<i32>} : memref<8x128xf32, #tpu.memory_space<vmem>>, vector<8x128xf32>,
    return
  }
  func.func @transform_0(%arg0: i32) -> (i32, i32) {
    %c0_i32 = arith.constant 0 : i32
    %c0_i32_0 = arith.constant 0 : i32
    return %arg0, %c0_i32 : i32, i32
  }
  func.func @transform_1(%arg0: i32) -> (i32, i32) {
    %c0_i32 = arith.constant 0 : i32
    %c0_i32_0 = arith.constant 0 : i32
    %c0_i32_1 = arith.constant 0 : i32
    return %c0_i32, %c0_i32_0 : i32, i32
  }
  func.func @transform_2(%arg0: i32) -> (i32, i32) {
    %c0_i32 = arith.constant 0 : i32
    %c0_i32_0 = arith.constant 0 : i32
    %c0_i32_1 = arith.constant 0 : i32
    return %c0_i32, %c0_i32_0 : i32, i32
  }
  func.func @transform_3(%arg0: i32) -> (i32, i32) {
    %c0_i32 = arith.constant 0 : i32
    %c0_i32_0 = arith.constant 0 : i32
    return %arg0, %c0_i32 : i32, i32
  }
}

</mosaic_0001>

<bundles_post_ra>
// kernel: fcnet_forward.1
= control target key start
LH: loop header
LB: loop body
LE: loop exit
PB: predicated region body
PF: predicated region fallthrough
CT: control target
= control target key end

     0   :  { %8 = vsyncpa [#allocation3], 0  ;;  %s1066_s0 = inlined_call_operand.vmem [shape: f32[2,784], index: 0, kind: input, shape index: {}]   ;;  %s1067_s1 = inlined_call_operand.hbm [shape: bf16[784,128], index: 1, kind: input, shape index: {}]   ;;  %s1068_s2 = inlined_call_operand.vmem [shape: f32[1,128], index: 2, kind: input, shape index: {}]   ;;  %s1069_s3 = inlined_call_operand.hbm [shape: f32[2,128], index: 3, kind: output, shape index: {}]  }
   0x1   :  { %9 = vsyncpa [#allocation4], 0  ;;  %s974_s12 = smov [#allocation2]   ;;  %s926_s16 = scalar_lea.hbm %s1067_s1, 6272 }
   0x2   :  { %s17_s13 = sshll.u32 %s974_s12, 4  ;;  %p927_p0 = scmp.ne.s32.totalorder %s1067_s1, %s926_s16  ;;  %s18_s13 = int_to_ptr.vmem [resolvable:$true] %s17_s13 }
   0x3   :  { %p930_p1 = scmp.lt.u32.totalorder %s926_s16, %s1067_s1 }
   0x5   :  { %p932_p2 = pnand %p930_p1, %p927_p0 }
   0x7   :  { %935 = shalt.err (!%p932_p2)
}
   0x8   :  { %s936_s21 = scalar_lea.vmem %s18_s13, 6272  ;;  %p941_p4 = scmp.lt.s32.totalorder %s18_s13, %s18_s13 }
   0x9   :  { %p937_p3 = scmp.ne.s32.totalorder %s18_s13, %s936_s21  ;;  %p942_p5 = scmp.lt.s32.totalorder %s936_s21, %s936_s21 }
   0xb   :  { %p943_p6 = por %p942_p5, %p941_p4 }
   0xd   :  { %p944_p7 = pnand %p943_p6, %p937_p3 }
   0xf   :  { %947 = shalt.err (!%p944_p7)
}
  0x10   :  { %s975_s22 = smov 64   ;;  %s976_s23 = smov 4  }
  0x11   :  { %23 = dma.hbm_to_vmem [thread:$0]  %s1067_s1, 6272, %s18_s13, [#allocation3], %s975_s22, %s975_s22, %s976_s23  }
  0x12   :  { %970 = dma.done.wait [#allocation3], 6272  }
  0x13   :  { %971 = vsyncadd [#allocation3], 4294961024  ;;  %v861_v0 = vld [vmem:[#allocation2 + $0x40] sm:$0xff]   ;;  %v865_v4 = vld [vmem:[#allocation2 + $0x48] sm:$0xff]   ;;  %v977_v23 = vmov 1983009808   ;;  %v53_v25 = vlaneseq }
  0x14   :  { %v862_v1 = vld [vmem:[#allocation2] sm:$0xff]   ;;  %778 = vmatprep.subr.bf16.mxu0 %v861_v0  ;;  %v866_v5 = vld [vmem:[#allocation2 + $0x8] sm:$0xff]   ;;  %v869_v8 = vld [vmem:[#allocation2 + $0x50] sm:$0xff]   ;;  %v51_v24 = vunpack.c.l.s4 %v977_v23  ;;  %v978_v47 = vmov 0.0   ;;  %vm979_vm0 = vmmov 0   ;;  %vm530_vm1 = vcmask 130048  }
  0x15   :  { %v863_v2 = vld [vmem:[#allocation2 + $0xc0] sm:$0xff]   ;;  %779 = vmatpush3.bf16.msra.mxu0 %v862_v1  ;;  %v867_v6 = vld [vmem:[#allocation2 + $0xc8] sm:$0xff]   ;;  %v870_v9 = vld [vmem:[#allocation2 + $0x10] sm:$0xff]   ;;  %v54_v31 = vshrl.u32 %v53_v25, 7 }
  0x16   :  { %v864_v3 = vld [vmem:[#allocation2 + $0x80] sm:$0xff]   ;;  %800 = vmatprep.subr.bf16.mxu1 %v863_v2  ;;  %780 = vmatprep.subr.bf16.mxu0 %v865_v4  ;;  %v868_v7 = vld [vmem:[#allocation2 + $0x88] sm:$0xff]   ;;  %v871_v10 = vld [vmem:[#allocation2 + $0xd0] sm:$0xff]   ;;  %v52_v30 = vunpack.c.0.s8 %v51_v24 }
  0x17   :  { %801 = vmatpush3.bf16.msra.mxu1 %v864_v3  ;;  %v872_v11 = vld [vmem:[#allocation2 + $0x90] sm:$0xff]   ;;  %v873_v12 = vld [vmem:[#allocation2 + $0x58] sm:$0xff]   ;;  %v877_v16 = vld [vmem:[#allocation2 + $0x60] sm:$0xff]  }
  0x18   :  { %802 = vmatprep.subr.bf16.mxu1 %v867_v6  ;;  %v874_v13 = vld [vmem:[#allocation2 + $0x18] sm:$0xff]   ;;  %v878_v17 = vld [vmem:[#allocation2 + $0x20] sm:$0xff]   ;;  %v881_v20 = vld [vmem:[#allocation2 + $0x68] sm:$0xff]   ;;  %v1016_v36 = vsub.s32 %v52_v30, %v54_v31 }
  0x19   :  { %781 = vmatpush3.bf16.msra.mxu0 %v866_v5  ;;  %v875_v14 = vld [vmem:[#allocation2 + $0xd8] sm:$0xff]   ;;  %v879_v18 = vld [vmem:[#allocation2 + $0xe0] sm:$0xff]   ;;  %v882_v21 = vld [vmem:[#allocation2 + $0x28] sm:$0xff]  }
  0x1a   :  { %782 = vmatprep.subr.bf16.mxu0 %v869_v8  ;;  %v876_v15 = vld [vmem:[#allocation2 + $0x98] sm:$0xff]   ;;  %v880_v19 = vld [vmem:[#allocation2 + $0xa0] sm:$0xff]   ;;  %v883_v22 = vld [vmem:[#allocation2 + $0xe8] sm:$0xff]  }
  0x1b   :  { %803 = vmatpush3.bf16.msra.mxu1 %v868_v7  ;;  %v884_v26 = vld [vmem:[#allocation2 + $0xa8] sm:$0xff]   ;;  %v885_v27 = vld [vmem:[#allocation2 + $0x70] sm:$0xff]   ;;  %v889_v33 = vld [vmem:[#allocation2 + $0x78] sm:$0xff]  }
  0x1c   :  { %804 = vmatprep.subr.bf16.mxu1 %v871_v10  ;;  %v886_v28 = vld [vmem:[#allocation2 + $0x30] sm:$0xff]   ;;  %v890_v34 = vld [vmem:[#allocation2 + $0x38] sm:$0xff]   ;;  %v897_v42 = vld [vmem:[#allocation2 + $0x140] sm:$0xff]  }
  0x1d   :  { %783 = vmatpush3.bf16.msra.mxu0 %v870_v9  ;;  %v887_v29 = vld [vmem:[#allocation2 + $0xf0] sm:$0xff]   ;;  %v891_v35 = vld [vmem:[#allocation2 + $0xf8] sm:$0xff]   ;;  %v900_v52 = vld [vmem:[#allocation2 + $0x100] sm:$0xff]  }
  0x1e   :  { %784 = vmatprep.subr.bf16.mxu0 %v873_v12  ;;  %v888_v32 = vld [vmem:[#allocation2 + $0xb0] sm:$0xff]   ;;  %v894_v38 = vld [vmem:[%s1066_s0 + $0x1c] ss:$14 sps:$4 sm:$0xff]   ;;  %v907_v63 = vld [vmem:[#allocation2 + $0x160] sm:$0xff]  }
  0x1f   :  { %805 = vmatpush3.bf16.msra.mxu1 %v872_v11  ;;  %v892_v37 = vld [vmem:[%s1066_s0] ss:$14 sps:$4 sm:$0xff]   ;;  %v896_v39 = vld [vmem:[#allocation2 + $0xb8] sm:$0xff]   ;;  %v70_v41 = vrot.slane %v894_v38, %v1016_v36  ;;  %v898_v43 = vld [vmem:[%s1066_s0 + $0x4] ss:$14 sps:$4 sm:$0xff]  }
  0x20   :  { %806 = vmatprep.subr.bf16.mxu1 %v875_v14  ;;  %v56_v40 = vrot.slane %v892_v37, %v1016_v36  ;;  %v899_v44 = vld [vmem:[%s1066_s0 + $0x20] ss:$14 sps:$4 sm:$0xff]   ;;  %v63_v48 = vrot.slane %v898_v43, %v1016_v36  ;;  %v905_v61 = vld [vmem:[#allocation2 + $0x158] sm:$0xff]   ;;  %v919_v4 = vld [vmem:[%s1066_s0 + $0x24] ss:$14 sps:$4 sm:$0xff]  }
  0x21   :  { %785 = vmatpush3.bf16.msra.mxu0 %v874_v13  ;;  %v77_v49 = vrot.slane %v899_v44, %v1016_v36  ;;  %v901_v55 = vld [vmem:[#allocation2 + $0x148] sm:$0xff]   ;;  %v903_v59 = vld [vmem:[#allocation2 + $0x150] sm:$0xff]   ;;  %v906_v62 = vld [vmem:[#allocation2 + $0x118] sm:$0xff]   ;;  %v106_v9 = vrot.slane %v919_v4, %v1016_v36 }
  0x22   :  { %786 = vmatprep.subr.bf16.mxu0 %v877_v16  ;;  %v79_v45 = vcombine.high %v56_v40, %v70_v41  ;;  %v78_v46 = vcombine.low %v56_v40, %v70_v41  ;;  %v902_v58 = vld [vmem:[#allocation2 + $0x108] sm:$0xff]   ;;  %v904_v60 = vld [vmem:[#allocation2 + $0x110] sm:$0xff]   ;;  %v915_v0 = vld [vmem:[#allocation2 + $0x180] sm:$0xff]  }
  0x23   :  { %807 = vmatpush3.bf16.msra.mxu1 %v876_v15  ;;  %v81_v53 = vcombine.high %v63_v48, %v77_v49  ;;  %v80_v54 = vcombine.low %v63_v48, %v77_v49  ;;  %v916_v1 = vld [vmem:[%s1066_s0 + $0x8] ss:$14 sps:$4 sm:$0xff]   ;;  %v918_v2 = vld [vmem:[%s1066_s0 + $0xc] ss:$14 sps:$4 sm:$0x33]   ;;  %v908_v3 = vld [vmem:[#allocation2 + $0x120] sm:$0xff]  }
  0x24   :  { %808 = vmatprep.subr.bf16.mxu1 %v879_v18  ;;  %v125_v50 = vpack.c.bf16 %v79_v45, %v79_v45  ;;  %v124_v51 = vpack.c.bf16 %v78_v46, %v78_v46  ;;  %v921_v5 = vld [vmem:[%s1066_s0 + $0x28] ss:$14 sps:$4 sm:$0x33]   ;;  %v92_v7 = vrot.slane %v916_v1, %v1016_v36  ;;  %v99_v8 = vrot.slane %v918_v2, %v1016_v36  ;;  %v913_v18 = vld [vmem:[#allocation2 + $0x178] sm:$0xff]   ;;  %v727_v23 = vld [vmem:[%s1068_s2] ss:$0 sm:$0xff] }
  0x25   :  { %787 = vmatpush3.bf16.msra.mxu0 %v878_v17  ;;  %v127_v56 = vpack.c.bf16 %v81_v53, %v81_v53  ;;  %v126_v57 = vpack.c.bf16 %v80_v54, %v80_v54  ;;  %v909_v6 = vld [vmem:[#allocation2 + $0x168] sm:$0xff]   ;;  %v113_v10 = vrot.slane %v921_v5, %v1016_v36  ;;  %v911_v14 = vld [vmem:[#allocation2 + $0x170] sm:$0xff]   ;;  %v695_v45 = vand.u32 127, %v53_v25 }
  0x26   :  { %788 = vmatprep.subr.bf16.mxu0 %v881_v20  ;;  %566 = vmatprep.mubr.bf16.mxu0 %v125_v50  ;;  %v910_v11 = vld [vmem:[#allocation2 + $0x128] sm:$0xff]   ;;  %v115_v12 = vcombine.high %v92_v7, %v106_v9  ;;  %v912_v17 = vld [vmem:[#allocation2 + $0x130] sm:$0xff]   ;;  %v914_v20 = vld [vmem:[#allocation2 + $0x138] sm:$0xff]  }
  0x27   :  { %809 = vmatpush3.bf16.msra.mxu1 %v880_v19  ;;  %606 = vmatprep.mubr.bf16.mxu1 %v127_v56  ;;  %v116_v13 = vcombine.low %v99_v8, %v113_v10  ;;  %v114_v19 = vcombine.low %v92_v7, %v106_v9  ;;  %vm696_vm2 = vcmp.lt.s32.totalorder %v695_v45, 20 }
  0x28   :  { %810 = vmatprep.subr.bf16.mxu1 %v883_v22  ;;  %v129_v15 = vpack.c.bf16 %v115_v12, %v115_v12 }
  0x29   :  { %789 = vmatpush3.bf16.msra.mxu0 %v882_v21  ;;  %v130_v16 = vpack.c.bf16 %v116_v13, %v116_v13  ;;  %v128_v21 = vpack.c.bf16 %v114_v19, %v114_v19 }
  0x2a   :  { %790 = vmatprep.subr.bf16.mxu0 %v885_v27 }
  0x2b   :  { %811 = vmatpush3.bf16.msra.mxu1 %v884_v26 }
  0x2c   :  { %812 = vmatprep.subr.bf16.mxu1 %v887_v29 }
  0x2d   :  { %791 = vmatpush3.bf16.msra.mxu0 %v886_v28 }
  0x2e   :  { %792 = vmatprep.subr.bf16.mxu0 %v889_v33 }
  0x2f   :  { %813 = vmatpush3.bf16.msra.mxu1 %v888_v32 }
  0x30   :  { %814 = vmatprep.subr.bf16.mxu1 %v891_v35 }
  0x31   :  { %793 = vmatpush3.bf16.msra.mxu0 %v890_v34 }
  0x32   :  { %822 = vmatprep.subr.bf16.mxu0 %v897_v42 }
  0x33   :  { %815 = vmatpush3.bf16.msra.mxu1 %v896_v39 }
  0x34   :  { %846 = vmatprep.subr.bf16.mxu1 %v978_v47  ;;  %567 = vmatmul.mubr.bf16.vlgmr.msra.gmra.mrb[0].mxu0 %v124_v51 }
  0x35   :  { %823 = vmatpush3.bf16.msra.mxu0 %v900_v52  ;;  %646 = vmatprep.mubr.bf16.mxu0 %v129_v15 }
  0x36   :  { %824 = vmatprep.subr.bf16.mxu0 %v901_v55  ;;  %607 = vmatmul.mubr.bf16.vlgmr.msra.gmra.mrb[0].mxu1 %v126_v57 }
  0x37   :  { %848 = vmatprep.mubr.msk.bf16.mxu1 %vm979_vm0, %v978_v47  ;;  %847 = vmatpush3.bf16.msra.mxu1 %v915_v0 }
  0x39   :  { %825 = vmatpush3.bf16.msra.mxu0 %v902_v58 }
  0x3a   :  { %826 = vmatprep.subr.bf16.mxu0 %v903_v59 }
  0x3d   :  { %827 = vmatpush3.bf16.msra.mxu0 %v904_v60 }
  0x3e   :  { %828 = vmatprep.subr.bf16.mxu0 %v905_v61  ;;  %849 = vmatmul.mubr.msk.bf16.vlgmr.msra.gmra.mrb[4].mxu1 %vm530_vm1, %v130_v16 }
  0x41   :  { %829 = vmatpush3.bf16.msra.mxu0 %v906_v62 }
  0x42   :  { %830 = vmatprep.subr.bf16.mxu0 %v907_v63 }
  0x45   :  { %831 = vmatpush3.bf16.msra.mxu0 %v908_v3 }
  0x46   :  { %832 = vmatprep.subr.bf16.mxu0 %v909_v6 }
  0x49   :  { %833 = vmatpush3.bf16.msra.mxu0 %v910_v11 }
  0x4a   :  { %834 = vmatprep.subr.bf16.mxu0 %v911_v14 }
  0x4d   :  { %835 = vmatpush3.bf16.msra.mxu0 %v912_v17 }
  0x4e   :  { %836 = vmatprep.subr.bf16.mxu0 %v913_v18 }
  0x51   :  { %837 = vmatpush3.bf16.msra.mxu0 %v914_v20 }
  0x54   :  { %647 = vmatmul.mubr.bf16.vlgmr.msra.gmra.mrb[4].mxu0 %v128_v21 }
 0x107   :  { %v794_v22 = vpop.f32.mrb[0].mxu0 }
 0x108   :  { %v795_v24 = vpop.f32.mrb[1].mxu0 }
 0x109   :  { %v796_v26 = vadd.f32 %v795_v24, %v794_v22  ;;  %v797_v27 = vpop.f32.mrb[2].mxu0  ;;  %v816_v28 = vpop.f32.mrb[0].mxu1 }
 0x10a   :  { %v798_v29 = vpop.f32.mrb[3].mxu0  ;;  %v817_v31 = vpop.f32.mrb[1].mxu1 }
 0x10b   :  { %v569_v30 = vadd.f32 %v796_v26, %v727_v23  ;;  %v818_v32 = vadd.f32 %v817_v31, %v816_v28  ;;  %v819_v33 = vpop.f32.mrb[2].mxu1 }
 0x10c   :  { %v820_v34 = vpop.f32.mrb[3].mxu1 }
 0x10d   :  { %v609_v35 = vadd.f32 %v818_v32, %v569_v30 }
 0x111   :  { %v688_v36 = vpop.f32.mrb[4].mxu1 }
 0x112   :  { %v850_v37 = vpop.f32.mrb[5].mxu1 }
 0x113   :  { %v691_v38 = vpop.f32.mrb[6].mxu1 }
 0x114   :  { %v851_v39 = vpop.f32.mrb[7].mxu1 }
 0x127   :  { %v838_v40 = vpop.f32.mrb[4].mxu0 }
 0x128   :  { %v839_v41 = vpop.f32.mrb[5].mxu0 }
 0x129   :  { %v840_v42 = vadd.f32 %v839_v41, %v838_v40  ;;  %v841_v43 = vpop.f32.mrb[6].mxu0 }
 0x12a   :  { %v842_v44 = vpop.f32.mrb[7].mxu0 }
 0x12b   :  { %v649_v46 = vadd.f32 %v840_v42, %v609_v35 }
 0x12d   :  { %v689_v47 = vadd.f32 %v688_v36, %v649_v46 }
 0x12f   :  { %v697_v48 = vmax.f32 %v689_v47, 0.0 }
 0x131   :  { %v698_v49 = vsel %vm696_vm2, %v697_v48, -1e+30 }
 0x132   :  { %699 = vmax.xlane.f32.xlu0 %v698_v49 }
 0x1bf   :  { %v700_v50 = vpop.xlane.xlu0 %699 }
 0x1c0   :  { %v701_v51 = vsub.f32 %v698_v49, %v700_v50 }
 0x1c2   :  { %v702_v52 = vmul.f32 1.442695, %v701_v51 }
 0x1c4   :  { %922 = vpow2.f32 %v702_v52 }
 0x1ce   :  { %v923_v53 = vpop.eup %922 }
 0x1cf   :  { %704 = vadd.xlane.f32.xlu0 %v923_v53 }
 0x25c   :  { %v705_v54 = vpop.xlane.xlu0 %704 }
 0x25d   :  { %924 = vlog2.f32 %v705_v54 }
 0x267   :  { %v925_v55 = vpop.eup %924 }
 0x268   :  { %v707_v56 = vmul.f32 0.6931472, %v925_v55 }
 0x26a   :  { %v708_v57 = vsub.f32 %v701_v51, %v707_v56 }
 0x26c   :  { %709 = vst [vmem:[#allocation5] sm:$0xff] %v708_v57 }
 0x26d   :  { %714 = vsyncadd [#allocation4], 96  ;;  %s980_s2 = smov [#allocation5]  }
 0x26e   :  { %s715_s15 = sshll.u32 %s980_s2, 4  ;;  %s716_s15 = int_to_ptr.vmem [resolvable:$true] %s715_s15 }
 0x26f   :  { %s948_s16 = scalar_lea.vmem %s716_s15, 32  ;;  %s952_s17 = scalar_lea.vmem %s716_s15, 128 }
 0x270   :  { %p949_p8 = scmp.ne.s32.totalorder %s716_s15, %s948_s16  ;;  %p953_p9 = scmp.lt.s32.totalorder %s716_s15, %s716_s15 }
 0x271   :  { %p954_p10 = scmp.lt.s32.totalorder %s952_s17, %s948_s16 }
 0x273   :  { %p955_p11 = por %p954_p10, %p953_p9 }
 0x275   :  { %p956_p12 = pnand %p955_p11, %p949_p8 }
 0x277   :  { %959 = shalt.err (!%p956_p12)
}
 0x278   :  { %s960_s20 = scalar_lea.hbm %s1069_s3, 32 }
 0x279   :  { %p961_p13 = scmp.ne.s32.totalorder %s1069_s3, %s960_s20  ;;  %p964_p0 = scmp.lt.u32.totalorder %s960_s20, %s1069_s3 }
 0x27b   :  { %p966_p1 = pnand %p964_p0, %p961_p13 }
 0x27d   :  { %969 = shalt.err (!%p966_p1)
}
 0x27e   :  { %s981_s25 = smov 32   ;;  %s982_s1 = smov 2  }
 0x27f   :  { %721 = dma.vmem_to_hbm [thread:$0]  %s716_s15, 32, %s1069_s3, [#allocation4], %s981_s25, %s981_s25, %s982_s1  }
 0x280   :  { %972 = dma.done.wait [#allocation4], 128  }
 0x281   :  { %973 = vsyncadd [#allocation4], 4294967168 }
 0x282   :  { %725 = vsyncpa [#allocation3], 1 }
 0x283   :  { %726 = vsyncpa [#allocation4], 1 }

</bundles_post_ra>
